<compile_context>
chip_gen: v7x
topology: tpu7x:2x2x1
jax: 0.10.0
libtpu: 0.0.40
codegen_flags: <defaults>
</compile_context>

<pallas_src>
import functools

import jax
import jax.numpy as jnp
import numpy as np
from jax import lax
from jax.experimental import pallas as pl
from jax.experimental.pallas import tpu as pltpu


# --------------------------- projection kernel: feat = x @ W ---------------------------
def _project_kernel(x_ref, w_ref, out_ref):
    out_ref[...] = jnp.dot(x_ref[...], w_ref[...], preferred_element_type=jnp.float32)


def project(x, w, *, tile_r=None):
    n, f_in = x.shape
    hd = w.shape[1]
    if tile_r is None:
        tile_r = n if n <= 512 else 512
    tile_r = min(tile_r, n)
    if n % tile_r != 0:
        tile_r = n
    assert tile_r == n or tile_r % 8 == 0
    grid = (n // tile_r,)
    cost = pl.CostEstimate(flops=2 * n * f_in * hd, transcendentals=0,
                           bytes_accessed=(n * f_in + f_in * hd + n * hd) * 4)
    return pl.pallas_call(
        _project_kernel,
        out_shape=jax.ShapeDtypeStruct((n, hd), jnp.float32),
        grid=grid,
        in_specs=[pl.BlockSpec((tile_r, f_in), lambda i: (i, 0)),   # x rows (tiled)
                  pl.BlockSpec((f_in, hd), lambda i: (0, 0))],      # W (resident)
        out_specs=pl.BlockSpec((tile_r, hd), lambda i: (i, 0)),
        compiler_params=pltpu.CompilerParams(dimension_semantics=("parallel",)),
        cost_estimate=cost,
    )(x, w)


# ------------------------------ attention / aggregation kernel ------------------------------
def _gat_attn_kernel(adjt_ref, fs_ref, al_ref, ar_ref, b_ref, out_ref,
                     *, num_heads, out_feats, apply_elu, tile_v):
    # adjt_ref: (Tv, N) bf16, adjt[v, u] = 1 iff edge u -> v (rows = this tile's destinations)
    # fs_ref  : (N, H*D) f32 projected features (constant block index -> resident)
    # al/ar   : (H, D), b: (1, H*D), out: (Tv, H*D)
    mask = adjt_ref[...].astype(jnp.float32)                             # (Tv, N)
    fs_all = fs_ref[...]                                                 # (N, H*D)
    # Destination rows of this tile: aligned dynamic sublane slice from the resident block
    # (no second HBM stream for the projected features).
    row0 = pl.multiple_of(pl.program_id(0) * tile_v, tile_v)
    fd_all = fs_ref[pl.ds(row0, tile_v), :]                              # (Tv, H*D)
    al = al_ref[...]
    ar = ar_ref[...]

    # Additive -1e30 mask bias: computed once per tile, shared by every head.
    neg_bias = (mask - 1.0) * jnp.float32(1e30)                          # (Tv, N)

    head_outs = []
    for h in range(num_heads):                                           # small, static
        lo = h * out_feats
        fs = fs_all[:, lo:lo + out_feats]                                # (N, D)
        fd = fd_all[:, lo:lo + out_feats]                                # (Tv, D)
        al_h = al[h:h + 1, :]                                            # (1, D)
        ar_h = ar[h:h + 1, :]                                            # (1, D)

        # er[v] on the VPU/XLU (multiply + lane reduce).  el[u] goes through the MXU because
        # the (1, N) row layout it produces is exactly what the broadcast below needs
        # (avoids an explicit (N,1)->(1,N) transpose).
        er = jnp.sum(fd * ar_h, axis=-1, keepdims=True)                  # (Tv, 1)
        el = lax.dot_general(al_h, fs, (((1,), (1,)), ((), ())),
                             preferred_element_type=jnp.float32)         # (1, N)

        e = er + el                                                      # (Tv, N): e[v, u]
        e = jnp.maximum(e, 0.2 * e)                                      # leaky_relu(0.2)
        e = e + neg_bias                                                 # off-edges -> ~-1e30

        # Row softmax over sources (lane axis); normalization deferred past the MXU.
        m = jnp.max(e, axis=-1, keepdims=True)                           # (Tv, 1)
        p = mask * jnp.exp(e - m)                                        # (Tv, N); 0 off-edge
        denom = jnp.sum(p, axis=-1, keepdims=True)                       # (Tv, 1)
        # zero in-degree (allow_zero_in_degree=True): p row is all zeros -> agg == 0 below.
        inv = pl.reciprocal(jnp.maximum(denom, jnp.float32(1e-30)), approx=True)

        agg = jnp.dot(p, fs, preferred_element_type=jnp.float32)         # (Tv, D)
        head_outs.append(agg * inv)

    out = head_outs[0] if num_heads == 1 else jnp.concatenate(head_outs, axis=-1)
    out = out + b_ref[...]                                               # (Tv, H*D)
    if apply_elu:
        # clamp before exp so the positive branch never evaluates exp of a large value
        out = jnp.where(out > 0, out, jnp.exp(jnp.minimum(out, 0.0)) - 1.0)
    out_ref[...] = out                                                   # single lane-dense store


def _pick_tile_v(n, cap=512):
    # Destination-node tile: largest tile that keeps the (Tv, N) score slabs comfortably in
    # VMEM across all three generations (re-sweep per chip for production sizes).
    if n <= cap:
        return n
    for t in range(cap, 7, -8):        # largest multiple-of-8 divisor of n, <= cap
        if n % t == 0:
            return t
    return n


def _attn_vmem_limit_bytes(n, hd, tile_v):
    # Heuristic: resident projected features + double-buffered tiled blocks + a few (Tv, N)
    # f32 temporaries per head-iteration, with 2x headroom.  Never below the 32 MiB default,
    # never above v7x's 64 MiB physical VMEM.
    resident = n * hd * 4
    tiled = 2 * (tile_v * n * 2 + tile_v * hd * 4)
    temps = 6 * tile_v * n * 4 + 2 * tile_v * hd * 4
    est = 2 * (resident + tiled + temps) + (2 << 20)
    return int(max(32 << 20, min(est, 64 << 20)))


def gat_conv(x, adj_t, w, attn_l, attn_r, bias, *, num_heads, out_feats,
             apply_elu, tile_v=None):
    n = x.shape[0]
    hd = num_heads * out_feats
    if tile_v is None:
        tile_v = _pick_tile_v(n)
    tile_v = min(tile_v, n)
    assert n % tile_v == 0, "tile_v must divide N"
    assert tile_v == n or tile_v % 8 == 0, "tile_v must be a multiple of 8 (or == N)"
    grid = (n // tile_v,)

    # Phase 1: projection, computed exactly once (previously redone per destination tile).
    feat = project(x, w)                                                 # (N, H*D) f32

    kern = functools.partial(_gat_attn_kernel, num_heads=num_heads,
                             out_feats=out_feats, apply_elu=apply_elu, tile_v=tile_v)

    flops = (2 * n * n * hd                          # attention aggregation matmuls
             + grid[0] * 2 * n * hd                  # el row matmuls
             + 8 * n * n * num_heads)                # elementwise score work
    cost = pl.CostEstimate(flops=flops,
                           transcendentals=n * n * num_heads,
                           bytes_accessed=n * n * 2 + 2 * n * hd * 4)

    # Phase 2: masked attention softmax + neighborhood aggregation over destination tiles.
    return pl.pallas_call(
        kern,
        out_shape=jax.ShapeDtypeStruct((n, hd), jnp.float32),
        grid=grid,
        in_specs=[
            pl.BlockSpec((tile_v, n), lambda j: (j, 0)),                 # adj^T tile (bf16)
            pl.BlockSpec((n, hd), lambda j: (0, 0)),                     # feat (resident)
            pl.BlockSpec((num_heads, out_feats), lambda j: (0, 0)),      # attn_l
            pl.BlockSpec((num_heads, out_feats), lambda j: (0, 0)),      # attn_r
            pl.BlockSpec((1, hd), lambda j: (0, 0)),                     # bias
        ],
        out_specs=pl.BlockSpec((tile_v, hd), lambda j: (j, 0)),
        compiler_params=pltpu.CompilerParams(
            dimension_semantics=("parallel",),      # independent dst tiles -> both TCs on v7x
            vmem_limit_bytes=_attn_vmem_limit_bytes(n, hd, tile_v),
        ),
        cost_estimate=cost,
    )(adj_t, feat, attn_l, attn_r, bias)


def gat_forward(adj, features, params, *, num_heads, h_feats, num_classes, tile_v=None):
    # The kernels consume the transposed adjacency in bf16 (0/1 is exact in bf16, halves the
    # N*N HBM/VMEM traffic).  Computed once and reused by both layers.
    adj_t = adj.T.astype(jnp.bfloat16)
    # x = F.elu(conv1(g, features).flatten(1))
    h1 = gat_conv(features, adj_t, params["W1"], params["al1"], params["ar1"],
                  params["b1"], num_heads=num_heads, out_feats=h_feats,
                  apply_elu=True, tile_v=tile_v)                         # (N, H*h_feats)
    # x = conv2(g, x).mean(1)   (single head -> mean over heads is the identity)
    h2 = gat_conv(h1, adj_t, params["W2"], params["al2"], params["ar2"],
                  params["b2"], num_heads=1, out_feats=num_classes,
                  apply_elu=False, tile_v=tile_v)                        # (N, num_classes)
    return h2


# ----------------------- pure-JAX reference (for checking) -----------------------
def _ref_gat_conv(x, adj, w, al, ar, b, num_heads, out_feats):
    n = x.shape[0]
    h = (x @ w).reshape(n, num_heads, out_feats)
    el = jnp.einsum("nhd,hd->nh", h, al)          # (N, H)
    er = jnp.einsum("nhd,hd->nh", h, ar)          # (N, H)
    e = el[:, None, :] + er[None, :, :]           # (U, V, H)
    e = jnp.where(e > 0, e, 0.2 * e)
    mask = adj[:, :, None] > 0
    e_m = jnp.where(mask, e, -1e30)
    m = jnp.max(e_m, axis=0, keepdims=True)
    p = jnp.where(mask, jnp.exp(e_m - m), 0.0)
    denom = jnp.sum(p, axis=0, keepdims=True)
    alpha = p / jnp.maximum(denom, 1e-30)
    out = jnp.einsum("uvh,uhd->vhd", alpha, h)    # (N, H, D)
    return out.reshape(n, num_heads * out_feats) + b


def _ref_forward(adj, x, p, num_heads, h_feats, num_classes):
    h1 = _ref_gat_conv(x, adj, p["W1"], p["al1"], p["ar1"], p["b1"], num_heads, h_feats)
    h1 = jnp.where(h1 > 0, h1, jnp.exp(h1) - 1.0)
    h2 = _ref_gat_conv(h1, adj, p["W2"], p["al2"], p["ar2"], p["b2"], 1, num_classes)
    return h2


if __name__ == "__main__":
    N, IN_FEATS, H_FEATS, NUM_HEADS, NUM_CLASSES = 16, 8, 8, 4, 4
    TILE_V = 8   # 2 destination tiles -> exercises the grid / pipelining path

    key = jax.random.PRNGKey(0)
    k_feat, k_adj, k1, k2, k3, k4, k5, k6 = jax.random.split(key, 8)

    features = jax.random.normal(k_feat, (N, IN_FEATS), dtype=jnp.float32)
    # random directed graph + self-loops, as dense float adjacency (adj[u, v]: edge u -> v)
    adj = jax.random.bernoulli(k_adj, 0.3, (N, N)).astype(jnp.float32)
    adj = jnp.maximum(adj, jnp.eye(N, dtype=jnp.float32))

    params = {
        "W1": 0.2 * jax.random.normal(k1, (IN_FEATS, NUM_HEADS * H_FEATS), jnp.float32),
        "al1": 0.2 * jax.random.normal(k2, (NUM_HEADS, H_FEATS), jnp.float32),
        "ar1": 0.2 * jax.random.normal(k3, (NUM_HEADS, H_FEATS), jnp.float32),
        "b1": jnp.zeros((1, NUM_HEADS * H_FEATS), jnp.float32),
        "W2": 0.2 * jax.random.normal(k4, (NUM_HEADS * H_FEATS, NUM_CLASSES), jnp.float32),
        "al2": 0.2 * jax.random.normal(k5, (1, NUM_CLASSES), jnp.float32),
        "ar2": 0.2 * jax.random.normal(k6, (1, NUM_CLASSES), jnp.float32),
        "b2": jnp.zeros((1, NUM_CLASSES), jnp.float32),
    }

    out = gat_forward(adj, features, params, num_heads=NUM_HEADS, h_feats=H_FEATS,
                      num_classes=NUM_CLASSES, tile_v=TILE_V)
    out = jax.block_until_ready(out)

    ref = _ref_forward(adj, features, params, NUM_HEADS, H_FEATS, NUM_CLASSES)
    # tolerance loosened slightly vs f32 exact to cover the approximate EUP reciprocal
    np.testing.assert_allclose(np.asarray(out), np.asarray(ref), rtol=1e-2, atol=1e-3)

    assert out.shape == (N, NUM_CLASSES)
    print("KERNEL_OK")
</pallas_src>

<mosaic_0001>
module attributes {stable_mosaic.version = 11 : i64} {
  func.func @_project_kernel(%arg0: i32, %arg1: memref<16x8xf32, #tpu.memory_space<vmem>>, %arg2: memref<8x32xf32, #tpu.memory_space<vmem>>, %arg3: memref<16x32xf32, #tpu.memory_space<vmem>>) attributes {dimension_semantics = [#tpu.dimension_semantics<parallel>], iteration_bounds = array<i64: 1>, scalar_prefetch = 0 : i64, scratch_operands = 0 : i64, tpu.core_type = #tpu.core_type<tc>, window_params = [{transform_indices = @transform_0, window_bounds = array<i64: 16, 8>}, {pipeline_mode = #tpu.pipeline_mode<synchronous>, transform_indices = @transform_1, window_bounds = array<i64: 8, 32>}, {transform_indices = @transform_2, window_bounds = array<i64: 16, 32>}]} {
    %c0 = arith.constant 0 : index
    %c0_0 = arith.constant 0 : index
    %0 = vector.load %arg1[%c0, %c0_0] : memref<16x8xf32, #tpu.memory_space<vmem>>, vector<16x8xf32>
    %c0_1 = arith.constant 0 : index
    %c0_2 = arith.constant 0 : index
    %1 = vector.load %arg2[%c0_1, %c0_2] : memref<8x32xf32, #tpu.memory_space<vmem>>, vector<8x32xf32>
    %cst = arith.constant dense<0.000000e+00> : vector<16x32xf32>
    %2 = tpu.matmul %0, %1, %cst {dimension_numbers = #tpu.dot_dimension_numbers<[1], [0], [0], [1], [0, 0, 1, 1], [], []>} : vector<16x8xf32>, vector<8x32xf32>, vector<16x32xf32> -> vector<16x32xf32>
    %c0_3 = arith.constant 0 : index
    %c0_4 = arith.constant 0 : index
    %3 = vector.load %arg3[%c0_3, %c0_4] : memref<16x32xf32, #tpu.memory_space<vmem>>, vector<16x32xf32>
    tpu.vector_store %arg3[%c0_3, %c0_4], %2 {strides = array<i32>} : memref<16x32xf32, #tpu.memory_space<vmem>>, vector<16x32xf32>,
    return
  }
  func.func @transform_0(%arg0: i32) -> (i32, i32) {
    %c0_i32 = arith.constant 0 : i32
    %c0_i32_0 = arith.constant 0 : i32
    return %arg0, %c0_i32 : i32, i32
  }
  func.func @transform_1(%arg0: i32) -> (i32, i32) {
    %c0_i32 = arith.constant 0 : i32
    %c0_i32_0 = arith.constant 0 : i32
    %c0_i32_1 = arith.constant 0 : i32
    return %c0_i32, %c0_i32_0 : i32, i32
  }
  func.func @transform_2(%arg0: i32) -> (i32, i32) {
    %c0_i32 = arith.constant 0 : i32
    %c0_i32_0 = arith.constant 0 : i32
    return %arg0, %c0_i32 : i32, i32
  }
}

</mosaic_0001>

<bundles_post_ra>
// kernel: tpu_custom_call.1
= control target key start
LH: loop header
LB: loop body
LE: loop exit
PB: predicated region body
PF: predicated region fallthrough
CT: control target
= control target key end

     0   :  { %vm15_vm0 = vcmask 64512   ;;  %s192_s0 = inlined_call_operand.vmem [shape: f32[16,8], index: 0, kind: input, shape index: {}]   ;;  %s193_s1 = inlined_call_operand.vmem [shape: f32[8,32], index: 1, kind: input, shape index: {}]   ;;  %s194_s2 = inlined_call_operand.hbm [shape: f32[16,32], index: 2, kind: output, shape index: {}]  }
   0x1   :  { %v14_v0 = vld [vmem:[%s193_s1] sm:$0xff]  ;;  %v13_v2 = vld [vmem:[%s192_s0 + $0x8] sm:$0xff] }
   0x2   :  { %v12_v1 = vld [vmem:[%s192_s0] sm:$0xff]  ;;  %121 = vmatprep.subr.mxu0 %v14_v0 }
   0x3   :  { %123 = vmatprep.mubr.msk.f32.mxu0 %vm15_vm0, %v12_v1 }
   0x4   :  { %7 = vsyncpa [#allocation3], 0  ;;  %122 = vmatpush3.msra.mxu0 %v14_v0  ;;  %s153_s15 = smov [#allocation2]   ;;  %vm97_vm1 = vcmask 261120  }
   0x5   :  { %124 = vmatmul.mubr.msk.f32.vlgmr.msra.gmra.mrb[0].mxu0 %vm15_vm0, %v13_v2  ;;  %s105_s16 = sshll.u32 %s153_s15, 4  ;;  %s106_s16 = int_to_ptr.vmem [resolvable:$true] %s105_s16 }
   0x6   :  { %s129_s1 = scalar_lea.vmem %s106_s16, 256  ;;  %p134_p1 = scmp.lt.s32.totalorder %s106_s16, %s106_s16 }
   0x7   :  { %p130_p0 = scmp.ne.s32.totalorder %s106_s16, %s129_s1  ;;  %p135_p2 = scmp.lt.s32.totalorder %s129_s1, %s129_s1 }
   0x9   :  { %p136_p3 = por %p135_p2, %p134_p1 }
   0xb   :  { %p137_p4 = pnand %p136_p3, %p130_p0 }
  0xd8   :  { %v125_v3 = vpop.f32.mrb[0].mxu0 }
  0xd9   :  { %99 = vst.msk [vmem:[#allocation2 + $0x8] sm:$0xff] %vm97_vm1, %v125_v3  ;;  %v88_v4 = vpop.f32.mrb[1].mxu0 }
  0xda   :  { %98 = vst.msk [vmem:[#allocation2] sm:$0xff] %vm97_vm1, %v88_v4 }
  0xdb   :  { %140 = shalt.err (!%p137_p4)
}
  0xdc   :  { %s141_s18 = scalar_lea.hbm %s194_s2, 256 }
  0xdd   :  { %p142_p5 = scmp.ne.s32.totalorder %s194_s2, %s141_s18  ;;  %p145_p6 = scmp.lt.u32.totalorder %s141_s18, %s194_s2 }
  0xdf   :  { %p147_p7 = pnand %p145_p6, %p142_p5 }
  0xe1   :  { %150 = shalt.err (!%p147_p7)
}
  0xe2   :  { %s154_s23 = smov 128   ;;  %s155_s24 = smov 8  }
  0xe3   :  { %111 = dma.vmem_to_hbm [thread:$0]  %s106_s16, 256, %s194_s2, [#allocation3], %s154_s23, %s154_s23, %s155_s24  }
  0xe4   :  { %151 = dma.done.wait [#allocation3], 256  }
  0xe5   :  { %152 = vsyncadd [#allocation3], 4294967040 }
  0xe6   :  { %115 = vsyncpa [#allocation3], 1 }

</bundles_post_ra>
